<compile_context>
chip_gen: v5e
topology: v5e:2x2
jax: 0.10.0
libtpu: 0.0.40
codegen_flags: <defaults>
</compile_context>

<pallas_src>
import jax
import jax.numpy as jnp
from jax.experimental import pallas as pl
from jax.experimental.pallas import tpu as pltpu

LANE = 128  # TPU lane width


def mlp_kernel(x_ref,
               w1_ref, b1_ref,
               w2_ref, b2_ref,
               w3_ref, b3_ref,
               w4_ref, b4_ref,
               wq_ref, bq_ref,
               out_ref):
    x = x_ref[...]

    def linear(h, w_ref, b_ref):
        # bf16 inputs on the MXU, f32 accumulation; bias-add stays f32 (VPU).
        return jnp.dot(h.astype(jnp.bfloat16), w_ref[...],
                       preferred_element_type=jnp.float32) + b_ref[...]

    h = jnp.maximum(linear(x, w1_ref, b1_ref), 0.0)   # Linear(state, 256) + ReLU
    h = jnp.maximum(linear(h, w2_ref, b2_ref), 0.0)   # Linear(256, 128)  + ReLU
    h = jnp.maximum(linear(h, w3_ref, b3_ref), 0.0)   # Linear(128, 128)  + ReLU
    h = jnp.maximum(linear(h, w4_ref, b4_ref), 0.0)   # Linear(128, 64)   + ReLU
    q = linear(h, wq_ref, bq_ref)                     # Linear(64, padded head)
    out_ref[...] = q.astype(out_ref.dtype)            # lane-dense (width 128) store


def init_params(key, state_size, num_actions):
    """Deterministic init mimicking PyTorch's default Linear init
    (uniform(-1/sqrt(fan_in), 1/sqrt(fan_in))).  Weights stored [in, out]."""
    dims = [(state_size, 256), (256, 128), (128, 128), (128, 64), (64, num_actions)]
    params = []
    for i, (fan_in, fan_out) in enumerate(dims):
        kw, kb = jax.random.split(jax.random.fold_in(key, i))
        bound = 1.0 / (fan_in ** 0.5)
        w = jax.random.uniform(kw, (fan_in, fan_out), jnp.float32, -bound, bound)
        b = jax.random.uniform(kb, (1, fan_out), jnp.float32, -bound, bound)
        params.append((w, b))
    return params


def prepare_params(params, lane=LANE):
    """One-time prep: zero-pad the Q head to a lane-dense width and cast
    weights to bf16 (biases stay f32 for the f32 bias-add/ReLU path)."""
    prepared = []
    last = len(params) - 1
    for i, (w, b) in enumerate(params):
        if i == last:
            fan_out = w.shape[1]
            padded = ((fan_out + lane - 1) // lane) * lane
            if padded != fan_out:
                w = jnp.pad(w, ((0, 0), (0, padded - fan_out)))
                b = jnp.pad(b, ((0, 0), (0, padded - fan_out)))
        prepared.append((w.astype(jnp.bfloat16), b.astype(jnp.float32)))
    return prepared


def attention_model_forward(x, prepared_params, num_actions):
    """x: [batch, state_size] float32.  prepared_params from prepare_params().
    Returns [batch, num_actions] float32 Q-values."""
    batch, state_size = x.shape
    head_width = prepared_params[-1][0].shape[1]  # lane-padded head width

    flat_args = [x]
    for w, b in prepared_params:
        flat_args.extend([w, b])

    out_shape = jax.ShapeDtypeStruct((batch, head_width), jnp.float32)

    # Batch-tiled path: only worth a grid when the batch is big enough that a
    # 128/256-row tile fills the MXU; weights stay VMEM-resident across tiles.
    use_grid = batch >= 256 and batch % 128 == 0
    if use_grid:
        tile = 256 if batch % 256 == 0 else 128
        in_specs = [pl.BlockSpec((tile, state_size), lambda i: (i, 0))]
        for w, b in prepared_params:
            in_specs.append(pl.BlockSpec(w.shape, lambda i: (0, 0)))  # resident
            in_specs.append(pl.BlockSpec(b.shape, lambda i: (0, 0)))  # resident
        out = pl.pallas_call(
            mlp_kernel,
            out_shape=out_shape,
            grid=(batch // tile,),
            in_specs=in_specs,
            out_specs=pl.BlockSpec((tile, head_width), lambda i: (i, 0)),
            compiler_params=pltpu.CompilerParams(
                dimension_semantics=("parallel",)),
        )(*flat_args)
    else:
        # Small batch: gridless, single invocation, everything VMEM-resident.
        n_args = len(flat_args)
        out = pl.pallas_call(
            mlp_kernel,
            out_shape=out_shape,
            in_specs=[pl.BlockSpec(memory_space=pltpu.VMEM)] * n_args,
            out_specs=pl.BlockSpec(memory_space=pltpu.VMEM),
        )(*flat_args)

    return out[:, :num_actions]


def reference_forward(x, prepared_params, num_actions):
    """Pure-JAX reference following the exact same numeric path (bf16 weights,
    bf16 matmul inputs, f32 accumulation)."""
    h = x
    for w, b in prepared_params[:-1]:
        y = jnp.dot(h.astype(jnp.bfloat16), w,
                    preferred_element_type=jnp.float32) + b
        h = jnp.maximum(y, 0.0)
    w, b = prepared_params[-1]
    q = jnp.dot(h.astype(jnp.bfloat16), w,
                preferred_element_type=jnp.float32) + b
    return q[:, :num_actions]


if __name__ == "__main__":
    key = jax.random.PRNGKey(0)
    state_size, num_actions = 32, 8

    k_x, k_p = jax.random.split(key)
    raw_params = init_params(k_p, state_size, num_actions)
    params = prepare_params(raw_params)

    # 1) small batch -> gridless fused kernel
    x_small = jax.random.normal(k_x, (8, state_size), jnp.float32)
    q_small = jax.block_until_ready(
        attention_model_forward(x_small, params, num_actions))
    assert q_small.shape == (8, num_actions)
    ref_small = reference_forward(x_small, params, num_actions)
    assert jnp.allclose(q_small, ref_small, atol=1e-2, rtol=1e-2), \
        "small-batch mismatch vs reference"

    # 2) larger batch -> batch grid, VMEM-resident weights, parallel semantics
    x_big = jax.random.normal(jax.random.fold_in(k_x, 1),
                              (512, state_size), jnp.float32)
    q_big = jax.block_until_ready(
        attention_model_forward(x_big, params, num_actions))
    assert q_big.shape == (512, num_actions)
    ref_big = reference_forward(x_big, params, num_actions)
    assert jnp.allclose(q_big, ref_big, atol=1e-2, rtol=1e-2), \
        "big-batch mismatch vs reference"

    print("KERNEL_OK")
</pallas_src>

<mosaic_0001>
module attributes {stable_mosaic.version = 11 : i64} {
  func.func @mlp_kernel(%arg0: memref<8x32xf32, #tpu.memory_space<vmem>>, %arg1: memref<32x256xbf16, #tpu.memory_space<vmem>>, %arg2: memref<1x256xf32, #tpu.memory_space<vmem>>, %arg3: memref<256x128xbf16, #tpu.memory_space<vmem>>, %arg4: memref<1x128xf32, #tpu.memory_space<vmem>>, %arg5: memref<128x128xbf16, #tpu.memory_space<vmem>>, %arg6: memref<1x128xf32, #tpu.memory_space<vmem>>, %arg7: memref<128x64xbf16, #tpu.memory_space<vmem>>, %arg8: memref<1x64xf32, #tpu.memory_space<vmem>>, %arg9: memref<64x128xbf16, #tpu.memory_space<vmem>>, %arg10: memref<1x128xf32, #tpu.memory_space<vmem>>, %arg11: memref<8x128xf32, #tpu.memory_space<vmem>>) attributes {dimension_semantics = [], scalar_prefetch = 0 : i64, scratch_operands = 0 : i64, tpu.core_type = #tpu.core_type<tc>} {
    %c0 = arith.constant 0 : index
    %c0_0 = arith.constant 0 : index
    %0 = vector.load %arg0[%c0, %c0_0] : memref<8x32xf32, #tpu.memory_space<vmem>>, vector<8x32xf32>
    %1 = arith.truncf %0 : vector<8x32xf32> to vector<8x32xbf16>
    %c0_1 = arith.constant 0 : index
    %c0_2 = arith.constant 0 : index
    %2 = vector.load %arg1[%c0_1, %c0_2] : memref<32x256xbf16, #tpu.memory_space<vmem>>, vector<32x256xbf16>
    %cst = arith.constant dense<0.000000e+00> : vector<8x256xf32>
    %3 = tpu.matmul %1, %2, %cst {dimension_numbers = #tpu.dot_dimension_numbers<[1], [0], [0], [1], [0, 0, 1, 1], [], []>} : vector<8x32xbf16>, vector<32x256xbf16>, vector<8x256xf32> -> vector<8x256xf32>
    %c0_3 = arith.constant 0 : index
    %c0_4 = arith.constant 0 : index
    %4 = vector.load %arg2[%c0_3, %c0_4] : memref<1x256xf32, #tpu.memory_space<vmem>>, vector<1x256xf32>
    %5 = vector.broadcast %4 : vector<1x256xf32> to vector<8x256xf32>
    %6 = arith.addf %3, %5 : vector<8x256xf32>
    %cst_5 = arith.constant 0.000000e+00 : f32
    %7 = vector.broadcast %cst_5 : f32 to vector<8x256xf32>
    %8 = arith.maximumf %6, %7 : vector<8x256xf32>
    %9 = arith.truncf %8 : vector<8x256xf32> to vector<8x256xbf16>
    %c0_6 = arith.constant 0 : index
    %c0_7 = arith.constant 0 : index
    %10 = vector.load %arg3[%c0_6, %c0_7] : memref<256x128xbf16, #tpu.memory_space<vmem>>, vector<256x128xbf16>
    %cst_8 = arith.constant dense<0.000000e+00> : vector<8x128xf32>
    %11 = tpu.matmul %9, %10, %cst_8 {dimension_numbers = #tpu.dot_dimension_numbers<[1], [0], [0], [1], [0, 0, 1, 1], [], []>} : vector<8x256xbf16>, vector<256x128xbf16>, vector<8x128xf32> -> vector<8x128xf32>
    %c0_9 = arith.constant 0 : index
    %c0_10 = arith.constant 0 : index
    %12 = vector.load %arg4[%c0_9, %c0_10] : memref<1x128xf32, #tpu.memory_space<vmem>>, vector<1x128xf32>
    %13 = vector.broadcast %12 : vector<1x128xf32> to vector<8x128xf32>
    %14 = arith.addf %11, %13 : vector<8x128xf32>
    %cst_11 = arith.constant 0.000000e+00 : f32
    %15 = vector.broadcast %cst_11 : f32 to vector<8x128xf32>
    %16 = arith.maximumf %14, %15 : vector<8x128xf32>
    %17 = arith.truncf %16 : vector<8x128xf32> to vector<8x128xbf16>
    %c0_12 = arith.constant 0 : index
    %c0_13 = arith.constant 0 : index
    %18 = vector.load %arg5[%c0_12, %c0_13] : memref<128x128xbf16, #tpu.memory_space<vmem>>, vector<128x128xbf16>
    %cst_14 = arith.constant dense<0.000000e+00> : vector<8x128xf32>
    %19 = tpu.matmul %17, %18, %cst_14 {dimension_numbers = #tpu.dot_dimension_numbers<[1], [0], [0], [1], [0, 0, 1, 1], [], []>} : vector<8x128xbf16>, vector<128x128xbf16>, vector<8x128xf32> -> vector<8x128xf32>
    %c0_15 = arith.constant 0 : index
    %c0_16 = arith.constant 0 : index
    %20 = vector.load %arg6[%c0_15, %c0_16] : memref<1x128xf32, #tpu.memory_space<vmem>>, vector<1x128xf32>
    %21 = vector.broadcast %20 : vector<1x128xf32> to vector<8x128xf32>
    %22 = arith.addf %19, %21 : vector<8x128xf32>
    %cst_17 = arith.constant 0.000000e+00 : f32
    %23 = vector.broadcast %cst_17 : f32 to vector<8x128xf32>
    %24 = arith.maximumf %22, %23 : vector<8x128xf32>
    %25 = arith.truncf %24 : vector<8x128xf32> to vector<8x128xbf16>
    %c0_18 = arith.constant 0 : index
    %c0_19 = arith.constant 0 : index
    %26 = vector.load %arg7[%c0_18, %c0_19] : memref<128x64xbf16, #tpu.memory_space<vmem>>, vector<128x64xbf16>
    %cst_20 = arith.constant dense<0.000000e+00> : vector<8x64xf32>
    %27 = tpu.matmul %25, %26, %cst_20 {dimension_numbers = #tpu.dot_dimension_numbers<[1], [0], [0], [1], [0, 0, 1, 1], [], []>} : vector<8x128xbf16>, vector<128x64xbf16>, vector<8x64xf32> -> vector<8x64xf32>
    %c0_21 = arith.constant 0 : index
    %c0_22 = arith.constant 0 : index
    %28 = vector.load %arg8[%c0_21, %c0_22] : memref<1x64xf32, #tpu.memory_space<vmem>>, vector<1x64xf32>
    %29 = vector.broadcast %28 : vector<1x64xf32> to vector<8x64xf32>
    %30 = arith.addf %27, %29 : vector<8x64xf32>
    %cst_23 = arith.constant 0.000000e+00 : f32
    %31 = vector.broadcast %cst_23 : f32 to vector<8x64xf32>
    %32 = arith.maximumf %30, %31 : vector<8x64xf32>
    %33 = arith.truncf %32 : vector<8x64xf32> to vector<8x64xbf16>
    %c0_24 = arith.constant 0 : index
    %c0_25 = arith.constant 0 : index
    %34 = vector.load %arg9[%c0_24, %c0_25] : memref<64x128xbf16, #tpu.memory_space<vmem>>, vector<64x128xbf16>
    %cst_26 = arith.constant dense<0.000000e+00> : vector<8x128xf32>
    %35 = tpu.matmul %33, %34, %cst_26 {dimension_numbers = #tpu.dot_dimension_numbers<[1], [0], [0], [1], [0, 0, 1, 1], [], []>} : vector<8x64xbf16>, vector<64x128xbf16>, vector<8x128xf32> -> vector<8x128xf32>
    %c0_27 = arith.constant 0 : index
    %c0_28 = arith.constant 0 : index
    %36 = vector.load %arg10[%c0_27, %c0_28] : memref<1x128xf32, #tpu.memory_space<vmem>>, vector<1x128xf32>
    %37 = vector.broadcast %36 : vector<1x128xf32> to vector<8x128xf32>
    %38 = arith.addf %35, %37 : vector<8x128xf32>
    %c0_29 = arith.constant 0 : index
    %c0_30 = arith.constant 0 : index
    %39 = vector.load %arg11[%c0_29, %c0_30] : memref<8x128xf32, #tpu.memory_space<vmem>>, vector<8x128xf32>
    tpu.vector_store %arg11[%c0_29, %c0_30], %38 {strides = array<i32>} : memref<8x128xf32, #tpu.memory_space<vmem>>, vector<8x128xf32>,
    return
  }
}

</mosaic_0001>

<bundles_post_ra>
// kernel: tpu_custom_call.1
= control target key start
LH: loop header
LB: loop body
LE: loop exit
PB: predicated region body
PF: predicated region fallthrough
CT: control target
= control target key end

     0   :  { %16 = vsyncpa [#allocation3], 0  ;;  %s1029_s0 = inlined_call_operand.hbm [shape: f32[8,32], index: 0, kind: input, shape index: {}]   ;;  %s1030_s1 = inlined_call_operand.vmem [shape: bf16[32,256], index: 1, kind: input, shape index: {}]   ;;  %s1031_s2 = inlined_call_operand.vmem [shape: f32[1,256], index: 2, kind: input, shape index: {}]   ;;  %s1032_s3 = inlined_call_operand.hbm [shape: bf16[256,128], index: 3, kind: input, shape index: {}]   ;;  %s1033_s4 = inlined_call_operand.vmem [shape: f32[1,128], index: 4, kind: input, shape index: {}]   ;;  %s1034_s5 = inlined_call_operand.vmem [shape: bf16[128,128], index: 5, kind: input, shape index: {}]   ;;  %s1035_s6 = inlined_call_operand.vmem [shape: f32[1,128], index: 6, kind: input, shape index: {}]   ;;  %s1036_s7 = inlined_call_operand.vmem [shape: bf16[128,64], index: 7, kind: input, shape index: {}]   ;;  %s1037_s8 = inlined_call_operand.vmem [shape: f32[1,64], index: 8, kind: input, shape index: {}]   ;;  %s1038_s9 = inlined_call_operand.hbm [shape: bf16[64,128], index: 9, kind: input, shape index: {}]   ;;  %s1039_s10 = inlined_call_operand.vmem [shape: f32[1,128], index: 10, kind: input, shape index: {}]   ;;  %s1040_s11 = inlined_call_operand.hbm [shape: f32[8,128], index: 11, kind: output, shape index: {}]  }
   0x1   :  { %17 = vsyncpa [#allocation6], 0  ;;  %s38_s19 = sshll.u32 %s1032_s3, 4  ;;  %s39_s19 = int_to_ptr.hbm [resolvable:$true] %s38_s19 }
   0x2   :  { %18 = vsyncpa [#allocation4], 0  ;;  %s864_s20 = smov [#allocation5]   ;;  %s24_s24 = sshll.u32 %s1029_s0, 4  ;;  %s25_s24 = int_to_ptr.hbm [resolvable:$true] %s24_s24 }
   0x3   :  { %s40_s21 = sshll.u32 %s864_s20, 4  ;;  %s865_s25 = smov 64   ;;  %s41_s21 = int_to_ptr.vmem [resolvable:$true] %s40_s21 }
   0x4   :  { %s866_s26 = smov 4   ;;  %s867_s27 = smov [#allocation2]  }
   0x5   :  { %46 = dma.hbm_to_vmem [thread:$0]  %s39_s19, 2048, %s41_s21, [#allocation6], %s865_s25, %s865_s25, %s866_s26  }
   0x6   :  { %s26_s28 = sshll.u32 %s867_s27, 4  ;;  %s61_s12 = sshll.u32 %s1038_s9, 4  ;;  %s27_s28 = int_to_ptr.vmem [resolvable:$true] %s26_s28  ;;  %s62_s12 = int_to_ptr.hbm [resolvable:$true] %s61_s12 }
   0x7   :  { %29 = dma.hbm_to_vmem [thread:$0]  %s25_s24, 128, %s27_s28, [#allocation3]  }
   0x8   :  { %s868_s3 = smov [#allocation7]  }
   0x9   :  { %s63_s13 = sshll.u32 %s868_s3, 4  ;;  %s64_s13 = int_to_ptr.vmem [resolvable:$true] %s63_s13 }
   0xa   :  { %69 = dma.hbm_to_vmem [thread:$0]  %s62_s12, 512, %s64_s13, [#allocation6], %s865_s25, %s865_s25, %s866_s26  }
   0xb   :  { %858 = dma.done.wait [#allocation3], 128  }
   0xc   :  { %859 = vsyncadd [#allocation3], 4294967168 }
   0xd   :  { %860 = dma.done.wait [#allocation6], 2560  }
   0xe   :  { %861 = vsyncadd [#allocation6], 4294964736  ;;  %v559_v0 = vld [vmem:[%s1030_s1 + $0x10] sm:$0xf]  ;;  %v715_v1 = vld [vmem:[%s1030_s1 + $0x14] sm:$0xf0] }
   0xf   :  { %v714_v2 = vld [vmem:[%s1030_s1 + $0x14] sm:$0xf]  ;;  %v560_v3 = vor.u32 %v715_v1, %v559_v0  ;;  %v561_v4 = vld [vmem:[%s1030_s1 + $0x18] sm:$0xf0]  ;;  %v551_v5 = vld [vmem:[%s1030_s1] sm:$0xf] }
  0x10   :  { %v713_v6 = vld [vmem:[%s1030_s1 + $0x4] sm:$0xf0]  ;;  %v564_v7 = vor.u32 %v714_v2, %v561_v4  ;;  %v712_v8 = vld [vmem:[%s1030_s1 + $0x4] sm:$0xf]  ;;  %v553_v9 = vld [vmem:[%s1030_s1 + $0x8] sm:$0xf0] }
  0x11   :  { %127 = vmatpush.bf16.msra.mxu0 %v560_v3  ;;  %v552_v10 = vor.u32 %v713_v6, %v551_v5  ;;  %v85_v11 = vld [vmem:[#allocation2] sm:$0xff]  ;;  %v556_v14 = vor.u32 %v712_v8, %v553_v9  ;;  %v722_v15 = vld [vmem:[#allocation5 + $0x30] sm:$0xff]  ;;  %vm117_vm0 = vcmask 261120   ;;  %v721_v18 = vld [vmem:[#allocation5 + $0x28] sm:$0xff]  ;;  %vm513_vm1 = vcmask 523264   ;;  %s538_s22 = sshll.u32 %s1040_s11, 4  ;;  %s539_s22 = int_to_ptr.hbm [resolvable:$true] %s538_s22 }
  0x12   :  { %v723_v12 = vld [vmem:[#allocation5 + $0x38] sm:$0xff]  ;;  %140 = vmatpush.bf16.msra.mxu1 %v564_v7  ;;  %v730_v16 = vld [vmem:[#allocation5 + $0x70] sm:$0xff]  ;;  %v86_v17 = vpack.c.bf16 %v85_v11, %v85_v11  ;;  %v729_v19 = vld [vmem:[#allocation5 + $0x68] sm:$0xff] }
  0x13   :  { %v731_v13 = vld [vmem:[#allocation5 + $0x78] sm:$0xff]  ;;  %283 = vmatpush.bf16.msra.mxu2 %v723_v12  ;;  %v720_v20 = vld [vmem:[#allocation5 + $0x20] sm:$0xff]  ;;  %v718_v24 = vld [vmem:[#allocation5 + $0x10] sm:$0xff] }
  0x14   :  { %296 = vmatpush.bf16.msra.mxu3 %v731_v13  ;;  %v728_v21 = vld [vmem:[#allocation5 + $0x60] sm:$0xff]  ;;  %v719_v22 = vld [vmem:[#allocation5 + $0x18] sm:$0xff]  ;;  %v726_v25 = vld [vmem:[#allocation5 + $0x50] sm:$0xff] }
  0x15   :  { %128 = vmatpush.bf16.msra.mxu0 %v552_v10  ;;  %v727_v23 = vld [vmem:[#allocation5 + $0x58] sm:$0xff]  ;;  %v717_v26 = vld [vmem:[#allocation5 + $0x8] sm:$0xff]  ;;  %v716_v28 = vld [vmem:[#allocation5] sm:$0xff] }
  0x16   :  { %141 = vmatpush.bf16.msra.mxu1 %v556_v14  ;;  %v725_v27 = vld [vmem:[#allocation5 + $0x48] sm:$0xff]  ;;  %v724_v29 = vld [vmem:[#allocation5 + $0x40] sm:$0xff]  ;;  %v739_v30 = vld [vmem:[%s1034_s5 + $0x38] sm:$0xff] }
  0x17   :  { %284 = vmatpush.bf16.msra.mxu2 %v722_v15  ;;  %v738_v31 = vld [vmem:[%s1034_s5 + $0x30] sm:$0xff]  ;;  %v737_v32 = vld [vmem:[%s1034_s5 + $0x28] sm:$0xff]  ;;  %v736_v33 = vld [vmem:[%s1034_s5 + $0x20] sm:$0xff] }
  0x18   :  { %297 = vmatpush.bf16.msra.mxu3 %v730_v16  ;;  %565 = vmatmul.msk.bf16.vlgmr.msra.gmra.mxu0 %vm117_vm0, %v86_v17  ;;  %v735_v34 = vld [vmem:[%s1034_s5 + $0x18] sm:$0xff]  ;;  %v91_v35 = vld [vmem:[%s1031_s2] sm:$0x3]  ;;  %v734_v36 = vld [vmem:[%s1034_s5 + $0x10] sm:$0xff]  ;;  %s869_s2 = smov [#allocation8]  }
  0x19   :  { %566 = vmatmul.msk.bf16.vlgmr.msra.gmra.mxu1 %vm117_vm0, %v86_v17  ;;  %379 = vmatpush.bf16.msrb.mxu0 %v739_v30  ;;  %v93_v37 = vperm.slane %v91_v35, 0  ;;  %v94_v38 = vperm.slane %v91_v35, 1  ;;  %v733_v49 = vld [vmem:[%s1034_s5 + $0x8] sm:$0xff]  ;;  %v732_v50 = vld [vmem:[%s1034_s5] sm:$0xff]  ;;  %v747_v51 = vld [vmem:[%s1036_s7 + $0x38] sm:$0xff]  ;;  %s536_s19 = sshll.u32 %s869_s2, 4  ;;  %s537_s19 = int_to_ptr.vmem [resolvable:$true] %s536_s19 }
  0x1a   :  { %462 = vmatpush.bf16.msrb.mxu1 %v747_v51  ;;  %v746_v52 = vld [vmem:[%s1036_s7 + $0x30] sm:$0xff]  ;;  %v745_v53 = vld [vmem:[%s1036_s7 + $0x28] sm:$0xff]  ;;  %v744_v54 = vld [vmem:[%s1036_s7 + $0x20] sm:$0xff] }
  0x1b   :  { %285 = vmatpush.bf16.msra.mxu2 %v721_v18  ;;  %v743_v55 = vld [vmem:[%s1036_s7 + $0x18] sm:$0xff]  ;;  %v742_v56 = vld [vmem:[%s1036_s7 + $0x10] sm:$0xff]  ;;  %v758_v57 = vld [vmem:[%s1033_s4] ss:$0 sm:$0xff] }
  0x1c   :  { %298 = vmatpush.bf16.msra.mxu3 %v729_v19  ;;  %v741_v2 = vld [vmem:[%s1036_s7 + $0x8] sm:$0xff]  ;;  %v740_v3 = vld [vmem:[%s1036_s7] sm:$0xff]  ;;  %v750_v5 = vld [vmem:[#allocation7 + $0x10] sm:$0xff] }
  0x1d   :  { %380 = vmatpush.bf16.msrb.mxu0 %v738_v31  ;;  %v751_v4 = vld [vmem:[#allocation7 + $0x18] sm:$0xff]  ;;  %v749_v6 = vld [vmem:[#allocation7 + $0x8] sm:$0xff]  ;;  %v748_v13 = vld [vmem:[#allocation7] sm:$0xff] }
  0x1e   :  { %463 = vmatpush.bf16.msrb.mxu1 %v746_v52  ;;  %v759_v7 = vld [vmem:[%s1035_s6] ss:$0 sm:$0xff] }
  0x1f   :  { %286 = vmatpush.bf16.msra.mxu2 %v720_v20  ;;  %v760_v14 = vld [vmem:[%s1037_s8] ss:$0 sm:$0xff] }
  0x20   :  { %299 = vmatpush.bf16.msra.mxu3 %v728_v21  ;;  %v761_v20 = vld [vmem:[%s1039_s10] ss:$0 sm:$0xff] }
  0x21   :  { %381 = vmatpush.bf16.msrb.mxu0 %v737_v32 }
  0x22   :  { %464 = vmatpush.bf16.msrb.mxu1 %v745_v53 }
  0x23   :  { %287 = vmatpush.bf16.msra.mxu2 %v719_v22 }
  0x24   :  { %300 = vmatpush.bf16.msra.mxu3 %v727_v23 }
  0x25   :  { %382 = vmatpush.bf16.msrb.mxu0 %v736_v33 }
  0x26   :  { %465 = vmatpush.bf16.msrb.mxu1 %v744_v54 }
  0x27   :  { %288 = vmatpush.bf16.msra.mxu2 %v718_v24 }
  0x28   :  { %301 = vmatpush.bf16.msra.mxu3 %v726_v25 }
  0x29   :  { %383 = vmatpush.bf16.msrb.mxu0 %v735_v34 }
  0x2a   :  { %466 = vmatpush.bf16.msrb.mxu1 %v743_v55 }
  0x2b   :  { %289 = vmatpush.bf16.msra.mxu2 %v717_v26 }
  0x2c   :  { %302 = vmatpush.bf16.msra.mxu3 %v725_v27 }
  0x2d   :  { %384 = vmatpush.bf16.msrb.mxu0 %v734_v36 }
  0x2e   :  { %467 = vmatpush.bf16.msrb.mxu1 %v742_v56 }
  0x2f   :  { %290 = vmatpush.bf16.msra.mxu2 %v716_v28 }
  0x30   :  { %303 = vmatpush.bf16.msra.mxu3 %v724_v29 }
  0x31   :  { %385 = vmatpush.bf16.msrb.mxu0 %v733_v49 }
  0x32   :  { %468 = vmatpush.bf16.msrb.mxu1 %v741_v2 }
  0x33   :  { %521 = vmatpush.bf16.msrb.mxu2 %v751_v4 }
  0x35   :  { %386 = vmatpush.bf16.msrb.mxu0 %v732_v50 }
  0x36   :  { %469 = vmatpush.bf16.msrb.mxu1 %v740_v3 }
  0x37   :  { %522 = vmatpush.bf16.msrb.mxu2 %v750_v5 }
  0x3b   :  { %523 = vmatpush.bf16.msrb.mxu2 %v749_v6 }
  0x3f   :  { %524 = vmatpush.bf16.msrb.mxu2 %v748_v13 }
  0x95   :  { %v130_v39 = vpop.f32.mrf.mxu0 }
  0x96   :  { %v131_v40 = vadd.f32 %v130_v39, %v93_v37  ;;  %v143_v41 = vpop.f32.mrf.mxu1 }
  0x97   :  { %v144_v42 = vadd.f32 %v143_v41, %v94_v38 }
  0x98   :  { %v147_v43 = vmax.f32 %v131_v40, 0.0 }
  0x99   :  { %v148_v44 = vmax.f32 %v144_v42, 0.0 }
  0x9a   :  { %v149_v45 = vpack.c.bf16 %v147_v43, %v147_v43 }
  0x9b   :  { %v150_v46 = vpack.c.bf16 %v148_v44, %v148_v44 }
  0x9c   :  { %291 = vmatmul.bf16.vlgmr.msra.gmra.mxu2 %v149_v45 }
  0x9d   :  { %304 = vmatmul.bf16.vlgmr.msra.gmra.mxu3 %v150_v46  ;;  %v132_v47 = vpop.f32.mrf.mxu0 }
  0x9e   :  { %v145_v48 = vpop.f32.mrf.mxu1 }
 0x11f   :  { %v292_v58 = vpop.f32.mrf.mxu2 }
 0x120   :  { %v293_v59 = vadd.f32 %v758_v57, %v292_v58  ;;  %v305_v60 = vpop.f32.mrf.mxu3 }
 0x122   :  { %v306_v61 = vadd.f32 %v305_v60, %v293_v59 }
 0x124   :  { %v309_v62 = vmax.f32 %v306_v61, 0.0 }
 0x126   :  { %v310_v63 = vpack.c.bf16 %v309_v62, %v309_v62 }
 0x127   :  { %v294_v0 = vpop.f32.mrf.mxu2 }
 0x128   :  { %v307_v1 = vpop.f32.mrf.mxu3  ;;  %387 = vmatmul.bf16.vlgmr.msrb.gmra.mxu0 %v310_v63 }
 0x1a5   :  { %v388_v8 = vpop.f32.mrf.mxu0 }
 0x1a6   :  { %v389_v9 = vadd.f32 %v759_v7, %v388_v8 }
 0x1a8   :  { %v392_v10 = vmax.f32 %v389_v9, 0.0 }
 0x1aa   :  { %v393_v11 = vpack.c.bf16 %v392_v10, %v392_v10 }
 0x1ac   :  { %470 = vmatmul.bf16.vlgmr.msrb.gmra.mxu1 %v393_v11 }
 0x1ad   :  { %v390_v12 = vpop.f32.mrf.mxu0 }
 0x229   :  { %v471_v15 = vpop.f32.mrf.mxu1 }
 0x22a   :  { %v472_v16 = vadd.f32 %v760_v14, %v471_v15 }
 0x22c   :  { %v475_v17 = vmax.f32 %v472_v16, 0.0 }
 0x22e   :  { %v476_v18 = vpack.c.bf16 %v475_v17, %v475_v17 }
 0x230   :  { %711 = vmatmul.msk.bf16.vlgmr.msrb.gmra.mxu2 %vm513_vm1, %v476_v18 }
 0x231   :  { %v473_v19 = vpop.f32.mrf.mxu1 }
 0x2b3   :  { %v526_v21 = vpop.f32.mrf.mxu2 }
 0x2b4   :  { %v527_v22 = vadd.f32 %v761_v20, %v526_v21 }
 0x2b6   :  { %530 = vst [vmem:[#allocation8] sm:$0xff] %v527_v22 }
 0x2b7   :  { %541 = dma.vmem_to_hbm [thread:$0]  %s537_s19, 128, %s539_s22, [#allocation4]  }
 0x2bb   :  { %v528_v23 = vpop.f32.mrf.mxu2 }
 0x2bc   :  { %862 = dma.done.wait [#allocation4], 128  }
 0x2bd   :  { %863 = vsyncadd [#allocation4], 4294967168 }
 0x2be   :  { %546 = vsyncpa [#allocation3], 1 }
 0x2bf   :  { %547 = vsyncpa [#allocation6], 1 }
 0x2c0   :  { %548 = vsyncpa [#allocation4], 1 }

</bundles_post_ra>
